<compile_context>
chip_gen: v5e
topology: v5e:2x2
jax: 0.10.0
libtpu: 0.0.40
codegen_flags: <defaults>
</compile_context>

<pallas_src>
import functools
import math

import jax
import jax.numpy as jnp
from jax.experimental import pallas as pl
from jax.experimental.pallas import tpu as pltpu


# ---------------------------------------------------------------------------
# Kernels
# ---------------------------------------------------------------------------
def _linear_kernel_single_k(x_ref, w_ref, b_ref, o_ref):
    """Single K step: o = x @ w + b, no accumulator needed."""
    o_ref[...] = (
        jnp.dot(x_ref[...], w_ref[...], preferred_element_type=jnp.float32)
        + b_ref[...]
    ).astype(o_ref.dtype)


def _linear_kernel_multi_k_f32out(x_ref, w_ref, b_ref, o_ref):
    """Multi K step, f32 output: accumulate directly into the resident o_ref."""
    k = pl.program_id(2)

    @pl.when(k == 0)
    def _():
        o_ref[...] = pl.broadcast_to(b_ref[...], o_ref.shape)

    o_ref[...] += jnp.dot(
        x_ref[...], w_ref[...], preferred_element_type=jnp.float32
    )


def _linear_kernel_multi_k_acc(x_ref, w_ref, b_ref, o_ref, acc_ref):
    """Multi K step, non-f32 output: f32 VMEM accumulator, cast on last k."""
    k = pl.program_id(2)

    @pl.when(k == 0)
    def _():
        acc_ref[...] = pl.broadcast_to(b_ref[...], acc_ref.shape)

    acc_ref[...] += jnp.dot(
        x_ref[...], w_ref[...], preferred_element_type=jnp.float32
    )

    @pl.when(k == pl.num_programs(2) - 1)
    def _():
        o_ref[...] = acc_ref[...].astype(o_ref.dtype)


# ---------------------------------------------------------------------------
# Tile selection
# ---------------------------------------------------------------------------
def _round_up(x: int, m: int) -> int:
    return ((x + m - 1) // m) * m


def _sublane_multiple(dtype) -> int:
    # Sub-32-bit dtypes pack rows along sublanes: bf16 -> 16, int8/fp8 -> 32.
    return {4: 8, 2: 16, 1: 32}.get(jnp.dtype(dtype).itemsize, 8)


_TM_CANDS = (512, 384, 256, 128)
_TN_CANDS = (512, 384, 256, 128)
_TK_CANDS = (1024, 768, 512, 384, 256, 128)


def _pick_dim_tile(dim: int, candidates, align: int) -> int:
    """Smallest-padding tile from `candidates`; ties go to the larger tile."""
    if dim <= candidates[-1]:
        return _round_up(dim, align)
    best_t, best_waste = None, None
    for t in candidates:  # descending -> ties resolve to the larger tile
        waste = _round_up(dim, t) - dim
        if best_waste is None or waste < best_waste:
            best_t, best_waste = t, waste
    return best_t


def _pick_tiles(M: int, K: int, N: int, x_dtype, out_dtype):
    sub = max(_sublane_multiple(x_dtype), _sublane_multiple(out_dtype))
    tm = _pick_dim_tile(M, _TM_CANDS, sub)
    tn = _pick_dim_tile(N, _TN_CANDS, 128)
    tk = _pick_dim_tile(K, _TK_CANDS, 128)

    # v7x has 2 TensorCores per chip: make sure at least one "parallel" grid
    # axis can have extent >= 2 when the problem is large enough to split.
    # Splitting N is preferred (it partitions weight DMA traffic instead of
    # duplicating it).  This is a no-op on single-TC v5e/v6e.
    gm = -(-M // tm)
    gn = -(-N // tn)
    if gm == 1 and gn == 1:
        if tn >= 256:
            tn //= 2
        elif tm >= 2 * sub and M > sub:
            tm = _round_up((tm + 1) // 2, sub)
    return tm, tn, tk


# ---------------------------------------------------------------------------
# Wrapper
# ---------------------------------------------------------------------------
@functools.partial(jax.jit, static_argnames=("compute_dtype",))
def linear_forward(x, w, b, *, compute_dtype=None):
    """y = x @ w + b, fused Pallas TPU matmul + bias.

    x: [..., K]   (arbitrary leading dims, flattened internally)
    w: [K, N]     (transposed nn.Linear weight)
    b: [N]
    compute_dtype: optional (e.g. jnp.bfloat16) to run the matmul on the
        bf16 MXU path with f32 accumulation; output dtype stays x.dtype.
    """
    orig_shape = x.shape
    out_dtype = x.dtype
    K = orig_shape[-1]
    x2d = x.reshape(-1, K)
    M = x2d.shape[0]
    K2, N = w.shape
    assert K == K2, f"feature mismatch: x has {K}, w has {K2}"
    assert b.shape == (N,), f"bias shape {b.shape} != ({N},)"

    if compute_dtype is not None:
        x2d = x2d.astype(compute_dtype)
        w = w.astype(compute_dtype)

    tm, tn, tk = _pick_tiles(M, K, N, x2d.dtype, out_dtype)
    M_pad, K_pad, N_pad = _round_up(M, tm), _round_up(K, tk), _round_up(N, tn)

    # Zero-pad only when needed (zeros contribute nothing to the dot product).
    # Weight/bias padding can be hoisted to init time by the caller; here it
    # is skipped entirely for tile-aligned layers.
    if (M_pad, K_pad) != (M, K):
        x2d = jnp.pad(x2d, ((0, M_pad - M), (0, K_pad - K)))
    if (K_pad, N_pad) != (K, N):
        w = jnp.pad(w, ((0, K_pad - K), (0, N_pad - N)))
    b_p = b.astype(jnp.float32)
    if N_pad != N:
        b_p = jnp.pad(b_p, (0, N_pad - N))
    b_p = b_p.reshape(1, N_pad)

    gm, gn, gk = M_pad // tm, N_pad // tn, K_pad // tk

    # Cost estimate on padded shapes with actual re-streamed DMA traffic.
    x_isz = jnp.dtype(x2d.dtype).itemsize
    w_isz = jnp.dtype(w.dtype).itemsize
    o_isz = jnp.dtype(out_dtype).itemsize
    cost = pl.CostEstimate(
        flops=2 * M_pad * K_pad * N_pad,
        transcendentals=0,
        bytes_accessed=(
            M_pad * K_pad * x_isz * gn        # x re-streamed per N tile
            + K_pad * N_pad * w_isz * gm      # w re-streamed per M tile
            + M_pad * N_pad * o_isz           # output write
            + N_pad * 4 * gm                  # bias
        ),
    )

    use_acc = gk > 1 and jnp.dtype(out_dtype) != jnp.dtype(jnp.float32)

    # Live VMEM estimate (double-buffered inputs/outputs + optional acc).
    live_vmem = (
        2 * tm * tk * x_isz
        + 2 * tk * tn * w_isz
        + 2 * tm * tn * o_isz
        + 2 * tn * 4
        + (tm * tn * 4 if use_acc else 0)
    )

    if gk == 1:
        kernel = _linear_kernel_single_k
        grid = (gm, gn)
        in_specs = [
            pl.BlockSpec((tm, tk), lambda i, j: (i, 0)),   # x tile
            pl.BlockSpec((tk, tn), lambda i, j: (0, j)),   # w tile
            pl.BlockSpec((1, tn), lambda i, j: (0, j)),    # bias row
        ]
        out_specs = pl.BlockSpec((tm, tn), lambda i, j: (i, j))
        scratch_shapes = []
        dims = ("parallel", "parallel")
    else:
        kernel = _linear_kernel_multi_k_acc if use_acc else _linear_kernel_multi_k_f32out
        grid = (gm, gn, gk)
        in_specs = [
            pl.BlockSpec((tm, tk), lambda i, j, k: (i, k)),   # x tile
            pl.BlockSpec((tk, tn), lambda i, j, k: (k, j)),   # w tile
            pl.BlockSpec((1, tn), lambda i, j, k: (0, j)),    # bias row
        ]
        out_specs = pl.BlockSpec((tm, tn), lambda i, j, k: (i, j))
        scratch_shapes = [pltpu.VMEM((tm, tn), jnp.float32)] if use_acc else []
        dims = ("parallel", "parallel", "arbitrary")

    cp_kwargs = dict(dimension_semantics=dims)
    if live_vmem > (12 << 20):
        # v5e's scoped-VMEM default is 16 MiB; raise it, but stay well under
        # v7x's 64 MiB physical VMEM.
        cp_kwargs["vmem_limit_bytes"] = min(56 << 20, max(32 << 20, 2 * live_vmem))

    out = pl.pallas_call(
        kernel,
        out_shape=jax.ShapeDtypeStruct((M_pad, N_pad), out_dtype),
        grid_spec=pltpu.PrefetchScalarGridSpec(
            num_scalar_prefetch=0,
            grid=grid,
            in_specs=in_specs,
            out_specs=out_specs,
            scratch_shapes=scratch_shapes,
        ),
        compiler_params=pltpu.CompilerParams(**cp_kwargs),
        cost_estimate=cost,
    )(x2d, w, b_p)

    if (M_pad, N_pad) != (M, N):
        out = out[:M, :N]
    return out.reshape(orig_shape[:-1] + (N,))


# ---------------------------------------------------------------------------
# Parameter init mimicking nn.Linear defaults: U(-1/sqrt(fan_in), 1/sqrt(fan_in))
# ---------------------------------------------------------------------------
def init_linear_params(key, input_dim: int, output_dim: int, dtype=jnp.float32):
    kw, kb = jax.random.split(key)
    bound = 1.0 / math.sqrt(input_dim)
    w = jax.random.uniform(
        kw, (input_dim, output_dim), dtype, minval=-bound, maxval=bound
    )
    b = jax.random.uniform(kb, (output_dim,), dtype, minval=-bound, maxval=bound)
    return {"w": w, "b": b}


def linear_forward_ref(x, w, b):
    """Plain-JAX reference (f32 compute) for validation."""
    return (
        x.astype(jnp.float32) @ w.astype(jnp.float32) + b.astype(jnp.float32)
    ).astype(x.dtype)


# ---------------------------------------------------------------------------
# Self-test
# ---------------------------------------------------------------------------
if __name__ == "__main__":
    key = jax.random.PRNGKey(0)

    # 1) Small, module-like shape (single-K kernel path).
    key, kx, kp = jax.random.split(key, 3)
    batch, input_dim, output_dim = 8, 32, 16
    x = jax.random.normal(kx, (batch, input_dim), dtype=jnp.float32)
    p = init_linear_params(kp, input_dim, output_dim)
    out = jax.block_until_ready(linear_forward(x, p["w"], p["b"]))
    ref = linear_forward_ref(x, p["w"], p["b"])
    assert out.shape == (batch, output_dim)
    assert jnp.allclose(out, ref, atol=1e-5, rtol=1e-5), "mismatch (small case)"

    # 2) Non-tile-aligned shape: exercises padding + N-split for 2-TC chips.
    key, kx2, kp2 = jax.random.split(key, 3)
    x2 = jax.random.normal(kx2, (300, 200), dtype=jnp.float32)
    p2 = init_linear_params(kp2, 200, 150)
    out2 = jax.block_until_ready(linear_forward(x2, p2["w"], p2["b"]))
    ref2 = linear_forward_ref(x2, p2["w"], p2["b"])
    assert out2.shape == (300, 150)
    assert jnp.allclose(out2, ref2, atol=1e-4, rtol=1e-4), "mismatch (padded case)"

    # 3) Multi-K reduction, f32 output (accumulate directly into o_ref).
    key, kx3, kp3 = jax.random.split(key, 3)
    x3 = jax.random.normal(kx3, (16, 520), dtype=jnp.float32)
    p3 = init_linear_params(kp3, 520, 96)
    out3 = jax.block_until_ready(linear_forward(x3, p3["w"], p3["b"]))
    ref3 = linear_forward_ref(x3, p3["w"], p3["b"])
    assert out3.shape == (16, 96)
    assert jnp.allclose(out3, ref3, atol=1e-4, rtol=1e-4), "mismatch (multi-K f32)"

    # 4) bf16 inputs, multi-K (f32 VMEM accumulator + cast epilogue path).
    key, kx4, kp4 = jax.random.split(key, 3)
    x4 = jax.random.normal(kx4, (24, 300), dtype=jnp.bfloat16)
    p4 = init_linear_params(kp4, 300, 40, dtype=jnp.bfloat16)
    out4 = jax.block_until_ready(linear_forward(x4, p4["w"], p4["b"]))
    ref4 = linear_forward_ref(x4, p4["w"], p4["b"])
    assert out4.shape == (24, 40)
    assert jnp.allclose(
        out4.astype(jnp.float32), ref4.astype(jnp.float32), atol=2e-2, rtol=2e-2
    ), "mismatch (bf16 case)"

    print("KERNEL_OK")
</pallas_src>

<mosaic_0001>
module attributes {stable_mosaic.version = 11 : i64} {
  func.func @_linear_kernel_single_k(%arg0: i32, %arg1: i32, %arg2: memref<8x128xf32, #tpu.memory_space<vmem>>, %arg3: memref<128x128xf32, #tpu.memory_space<vmem>>, %arg4: memref<1x128xf32, #tpu.memory_space<vmem>>, %arg5: memref<8x128xf32, #tpu.memory_space<vmem>>) attributes {dimension_semantics = [#tpu.dimension_semantics<parallel>, #tpu.dimension_semantics<parallel>], iteration_bounds = array<i64: 1, 1>, scalar_prefetch = 0 : i64, scratch_operands = 0 : i64, tpu.core_type = #tpu.core_type<tc>, window_params = [{transform_indices = @transform_0, window_bounds = array<i64: 8, 128>}, {transform_indices = @transform_1, window_bounds = array<i64: 128, 128>}, {transform_indices = @transform_2, window_bounds = array<i64: 1, 128>}, {transform_indices = @transform_3, window_bounds = array<i64: 8, 128>}]} {
    %c0 = arith.constant 0 : index
    %c0_0 = arith.constant 0 : index
    %0 = vector.load %arg2[%c0, %c0_0] : memref<8x128xf32, #tpu.memory_space<vmem>>, vector<8x128xf32>
    %c0_1 = arith.constant 0 : index
    %c0_2 = arith.constant 0 : index
    %1 = vector.load %arg3[%c0_1, %c0_2] : memref<128x128xf32, #tpu.memory_space<vmem>>, vector<128x128xf32>
    %cst = arith.constant dense<0.000000e+00> : vector<8x128xf32>
    %2 = tpu.matmul %0, %1, %cst {dimension_numbers = #tpu.dot_dimension_numbers<[1], [0], [0], [1], [0, 0, 1, 1], [], []>} : vector<8x128xf32>, vector<128x128xf32>, vector<8x128xf32> -> vector<8x128xf32>
    %c0_3 = arith.constant 0 : index
    %c0_4 = arith.constant 0 : index
    %3 = vector.load %arg4[%c0_3, %c0_4] : memref<1x128xf32, #tpu.memory_space<vmem>>, vector<1x128xf32>
    %4 = vector.broadcast %3 : vector<1x128xf32> to vector<8x128xf32>
    %5 = arith.addf %2, %4 : vector<8x128xf32>
    %c0_5 = arith.constant 0 : index
    %c0_6 = arith.constant 0 : index
    %6 = vector.load %arg5[%c0_5, %c0_6] : memref<8x128xf32, #tpu.memory_space<vmem>>, vector<8x128xf32>
    tpu.vector_store %arg5[%c0_5, %c0_6], %5 {strides = array<i32>} : memref<8x128xf32, #tpu.memory_space<vmem>>, vector<8x128xf32>,
    return
  }
  func.func @transform_0(%arg0: i32, %arg1: i32) -> (i32, i32) {
    %c0_i32 = arith.constant 0 : i32
    %c0_i32_0 = arith.constant 0 : i32
    return %arg0, %c0_i32 : i32, i32
  }
  func.func @transform_1(%arg0: i32, %arg1: i32) -> (i32, i32) {
    %c0_i32 = arith.constant 0 : i32
    %c0_i32_0 = arith.constant 0 : i32
    return %c0_i32, %arg1 : i32, i32
  }
  func.func @transform_2(%arg0: i32, %arg1: i32) -> (i32, i32) {
    %c0_i32 = arith.constant 0 : i32
    %c0_i32_0 = arith.constant 0 : i32
    return %c0_i32, %arg1 : i32, i32
  }
  func.func @transform_3(%arg0: i32, %arg1: i32) -> (i32, i32) {
    %c0_i32 = arith.constant 0 : i32
    return %arg0, %arg1 : i32, i32
  }
}

</mosaic_0001>

<bundles_post_ra>
// kernel: linear_forward.1
= control target key start
LH: loop header
LB: loop body
LE: loop exit
PB: predicated region body
PF: predicated region fallthrough
CT: control target
= control target key end

     0   :  { %s179_s0 = inlined_call_operand.vmem [shape: f32[8,128], index: 0, kind: input, shape index: {}]   ;;  %s180_s1 = inlined_call_operand.vmem [shape: f32[128,128], index: 1, kind: input, shape index: {}]   ;;  %s181_s2 = inlined_call_operand.vmem [shape: f32[1,128], index: 2, kind: input, shape index: {}]   ;;  %s182_s3 = inlined_call_operand.hbm [shape: f32[8,128], index: 3, kind: output, shape index: {}]  }
   0x1   :  { %v31_v0 = vld [vmem:[%s180_s1 + $0x78] sm:$0xff]  ;;  %v30_v1 = vld [vmem:[%s180_s1 + $0x70] sm:$0xff]  ;;  %v29_v2 = vld [vmem:[%s180_s1 + $0x68] sm:$0xff] }
   0x2   :  { %36 = vmatpush.msra.mxu0 %v31_v0  ;;  %v28_v3 = vld [vmem:[%s180_s1 + $0x60] sm:$0xff]  ;;  %v27_v4 = vld [vmem:[%s180_s1 + $0x58] sm:$0xff] }
   0x4   :  { %37 = vmatpush.msra.mxu0 %v30_v1 }
   0x6   :  { %38 = vmatpush.msra.mxu0 %v29_v2 }
   0x7   :  { %8 = vsyncpa [#allocation3], 0  ;;  %v26_v5 = vld [vmem:[%s180_s1 + $0x50] sm:$0xff]  ;;  %v25_v6 = vld [vmem:[%s180_s1 + $0x48] sm:$0xff]  ;;  %s101_s21 = smov [#allocation2]   ;;  %s64_s25 = sshll.u32 %s182_s3, 4  ;;  %s65_s25 = int_to_ptr.hbm [resolvable:$true] %s64_s25 }
   0x8   :  { %39 = vmatpush.msra.mxu0 %v28_v3  ;;  %v24_v7 = vld [vmem:[%s180_s1 + $0x40] sm:$0xff]  ;;  %v23_v8 = vld [vmem:[%s180_s1 + $0x38] sm:$0xff]  ;;  %v22_v9 = vld [vmem:[%s180_s1 + $0x30] sm:$0xff]  ;;  %s62_s22 = sshll.u32 %s101_s21, 4  ;;  %s63_s22 = int_to_ptr.vmem [resolvable:$true] %s62_s22 }
   0x9   :  { %v21_v10 = vld [vmem:[%s180_s1 + $0x28] sm:$0xff]  ;;  %v20_v11 = vld [vmem:[%s180_s1 + $0x20] sm:$0xff]  ;;  %v19_v12 = vld [vmem:[%s180_s1 + $0x18] sm:$0xff] }
   0xa   :  { %40 = vmatpush.msra.mxu0 %v27_v4  ;;  %v18_v13 = vld [vmem:[%s180_s1 + $0x10] sm:$0xff]  ;;  %v17_v14 = vld [vmem:[%s180_s1 + $0x8] sm:$0xff]  ;;  %v16_v15 = vld [vmem:[%s180_s1] sm:$0xff] }
   0xb   :  { %v15_v16 = vld [vmem:[%s179_s0] sm:$0xff] }
   0xc   :  { %41 = vmatpush.msra.mxu0 %v26_v5  ;;  %v74_v17 = vld [vmem:[%s181_s2] ss:$0 sm:$0xff] }
   0xe   :  { %42 = vmatpush.msra.mxu0 %v25_v6 }
  0x10   :  { %43 = vmatpush.msra.mxu0 %v24_v7 }
  0x12   :  { %44 = vmatpush.msra.mxu0 %v23_v8 }
  0x14   :  { %45 = vmatpush.msra.mxu0 %v22_v9 }
  0x16   :  { %46 = vmatpush.msra.mxu0 %v21_v10 }
  0x18   :  { %47 = vmatpush.msra.mxu0 %v20_v11 }
  0x1a   :  { %48 = vmatpush.msra.mxu0 %v19_v12 }
  0x1c   :  { %49 = vmatpush.msra.mxu0 %v18_v13 }
  0x1e   :  { %50 = vmatpush.msra.mxu0 %v17_v14 }
  0x20   :  { %51 = vmatpush.msra.mxu0 %v16_v15 }
  0x21   :  { %52 = vmatmul.f32.vlgmr.msra.gmra.mxu0 %v15_v16 }
  0x9e   :  { %v53_v18 = vpop.f32.mrf.mxu0 }
  0x9f   :  { %v54_v19 = vadd.f32 %v74_v17, %v53_v18 }
  0xa1   :  { %56 = vst [vmem:[#allocation2] sm:$0xff] %v54_v19 }
  0xa2   :  { %67 = dma.vmem_to_hbm [thread:$0]  %s63_s22, 128, %s65_s25, [#allocation3]  }
  0xa3   :  { %99 = dma.done.wait [#allocation3], 128  }
  0xa4   :  { %100 = vsyncadd [#allocation3], 4294967168 }
  0xa5   :  { %72 = vsyncpa [#allocation3], 1 }

</bundles_post_ra>
